<compile_context>
chip_gen: v5e
topology: v5e:2x2
jax: 0.10.0
libtpu: 0.0.40
codegen_flags: <defaults>
</compile_context>

<pallas_src>
import jax
import jax.numpy as jnp
from jax.experimental import pallas as pl
from jax.experimental.pallas import tpu as pltpu


def make_ff_text_kernel(window_size: int, embed_size: int, padded_len: int,
                        batch_tile: int):
    W = window_size
    E = embed_size
    Lp = padded_len
    Lout = Lp - W + 1
    TB = batch_tile

    def kernel(idx_ref, emb_ref, w1_ref, b1_ref, w2_ref, b2_ref, o_ref, x_scr):
        # idx_ref : SMEM (B, Lp) int32 padded token indices (scalar prefetch)
        # emb_ref : VMEM (V, 1, E) f32 embedding table (resident; leading-axis gather)
        # w1_ref  : VMEM (Lout*E, H), b1_ref: (1, H)
        # w2_ref  : VMEM (H, C),      b2_ref: (1, C)
        # o_ref   : VMEM (TB, C)
        # x_scr   : VMEM (TB, Lp*E) scratch -- lane-dense flattened embedded slab
        b0 = pl.program_id(0) * TB

        # In-kernel embedding gather straight into the flattened slab.
        for b in range(TB):
            for t in range(Lp):
                tok = idx_ref[b0 + b, t]                       # scalar from SMEM
                x_scr[b:b + 1, t * E:(t + 1) * E] = emb_ref[tok]   # (1, E) row

        # Sliding-window max over time == W-1 slab-wide maxes on the flat layout.
        pooled = x_scr[:, 0:Lout * E]
        for k in range(1, W):
            pooled = jnp.maximum(pooled, x_scr[:, k * E:k * E + Lout * E])

        # Single fused (TB, Lout*E) x (Lout*E, H) matmul + bias + ReLU.
        h = jnp.dot(pooled, w1_ref[...], preferred_element_type=jnp.float32)
        h = jnp.maximum(h + b1_ref[...], 0.0)

        # Tiny second linear (left to the compiler; C is small).
        out = jnp.dot(h, w2_ref[...], preferred_element_type=jnp.float32) + b2_ref[...]
        o_ref[...] = out.astype(o_ref.dtype)

    return kernel


def ff_text_with_windows(x_idx, embed_w, w1, b1, w2, b2, *, window_size):
    """Full forward pass. x_idx: int32 [B, L]."""
    W = window_size
    B, L = x_idx.shape
    V, E = embed_w.shape
    H = w1.shape[1]
    C = w2.shape[1]
    Lp = L + 2 * (W - 1)
    Lout = L + W - 1
    assert w1.shape[0] == Lout * E, "w1 in_features must equal (L+W-1)*E"

    # Pad indices with token 0 (embedding row 0 acts as the pad vector).
    x_pad = jnp.pad(x_idx.astype(jnp.int32), ((0, 0), (W - 1, W - 1)),
                    constant_values=0)

    # Batch tile: a full sublane group (8) when the batch divides evenly,
    # otherwise the whole (small) batch in one tile.
    TB = 8 if (B % 8 == 0) else B
    grid = (B // TB,)

    # Embedding table reshaped so the gather index is on a leading (untiled) axis.
    emb3d = embed_w.reshape(V, 1, E)

    kernel = make_ff_text_kernel(W, E, Lp, TB)

    out = pl.pallas_call(
        kernel,
        out_shape=jax.ShapeDtypeStruct((B, C), jnp.float32),
        grid_spec=pltpu.PrefetchScalarGridSpec(
            num_scalar_prefetch=1,
            grid=grid,
            in_specs=[
                pl.BlockSpec((V, 1, E), lambda i, idx: (0, 0, 0)),       # embed table
                pl.BlockSpec((Lout * E, H), lambda i, idx: (0, 0)),      # w1 (resident)
                pl.BlockSpec((1, H), lambda i, idx: (0, 0)),             # b1
                pl.BlockSpec((H, C), lambda i, idx: (0, 0)),             # w2
                pl.BlockSpec((1, C), lambda i, idx: (0, 0)),             # b2
            ],
            out_specs=pl.BlockSpec((TB, C), lambda i, idx: (i, 0)),
            scratch_shapes=[pltpu.VMEM((TB, Lp * E), jnp.float32)],
        ),
        compiler_params=pltpu.CompilerParams(
            dimension_semantics=("parallel",),   # batch tiles shard across TCs (v7x)
        ),
    )(x_pad, emb3d, w1, b1.reshape(1, -1), w2, b2.reshape(1, -1))
    return out


def reference_forward(x_idx, embed_w, w1, b1, w2, b2, *, window_size):
    """Pure-JAX reference replicating the PyTorch module exactly."""
    W = window_size
    x_padded = jnp.pad(x_idx, ((0, 0), (W - 1, W - 1)), constant_values=0)
    x_emb = jnp.take(embed_w, x_padded, axis=0)        # (B, Lp, E)
    Lp = x_emb.shape[1]
    Lout = Lp - W + 1
    windows = jnp.stack([x_emb[:, k:k + Lout, :] for k in range(W)], axis=0)
    pooled = jnp.max(windows, axis=0)                  # (B, Lout, E)
    flat = pooled.reshape(pooled.shape[0], -1)         # (B, Lout*E)
    h = jnp.maximum(flat @ w1 + b1, 0.0)
    return h @ w2 + b2


if __name__ == "__main__":
    # Small, deterministic setup consistent with the module.
    n_classes = 5
    vocab_len = 50
    embed_size = 16
    hidden_size = 32
    window_size = 3
    max_word_length = 8   # "seq" length L used in the module's Linear sizing
    batch = 2

    key = jax.random.PRNGKey(0)
    k_emb, k_w1, k_b1, k_w2, k_b2, k_x = jax.random.split(key, 6)

    in_features = (max_word_length + window_size - 1) * embed_size

    embed_w = jax.random.normal(k_emb, (vocab_len, embed_size), jnp.float32) * 0.1
    w1 = jax.random.normal(k_w1, (in_features, hidden_size), jnp.float32) * 0.05
    b1 = jax.random.normal(k_b1, (hidden_size,), jnp.float32) * 0.05
    w2 = jax.random.normal(k_w2, (hidden_size, n_classes), jnp.float32) * 0.05
    b2 = jax.random.normal(k_b2, (n_classes,), jnp.float32) * 0.05

    x_idx = jax.random.randint(k_x, (batch, max_word_length), 0, vocab_len, jnp.int32)

    out = ff_text_with_windows(
        x_idx, embed_w, w1, b1, w2, b2, window_size=window_size
    )
    out = jax.block_until_ready(out)

    ref = reference_forward(
        x_idx, embed_w, w1, b1, w2, b2, window_size=window_size
    )
    assert out.shape == (batch, n_classes)
    assert jnp.allclose(out, ref, atol=1e-5, rtol=1e-5), "mismatch vs reference"

    print("KERNEL_OK")
</pallas_src>

<mosaic_0001>
module attributes {stable_mosaic.version = 11 : i64} {
  func.func @kernel(%arg0: i32, %arg1: memref<2x12xi32, #tpu.memory_space<smem>>, %arg2: memref<50x1x16xf32, #tpu.memory_space<vmem>>, %arg3: memref<160x32xf32, #tpu.memory_space<vmem>>, %arg4: memref<1x32xf32, #tpu.memory_space<vmem>>, %arg5: memref<32x5xf32, #tpu.memory_space<vmem>>, %arg6: memref<1x5xf32, #tpu.memory_space<vmem>>, %arg7: memref<2x5xf32, #tpu.memory_space<vmem>>, %arg8: memref<2x192xf32, #tpu.memory_space<vmem>>) attributes {dimension_semantics = [#tpu.dimension_semantics<parallel>], iteration_bounds = array<i64: 1>, scalar_prefetch = 1 : i64, scratch_operands = 1 : i64, tpu.core_type = #tpu.core_type<tc>, window_params = [{pipeline_mode = #tpu.pipeline_mode<synchronous>, transform_indices = @transform_0, window_bounds = array<i64: 50, 1, 16>}, {pipeline_mode = #tpu.pipeline_mode<synchronous>, transform_indices = @transform_1, window_bounds = array<i64: 160, 32>}, {pipeline_mode = #tpu.pipeline_mode<synchronous>, transform_indices = @transform_2, window_bounds = array<i64: 1, 32>}, {pipeline_mode = #tpu.pipeline_mode<synchronous>, transform_indices = @transform_3, window_bounds = array<i64: 32, 5>}, {pipeline_mode = #tpu.pipeline_mode<synchronous>, transform_indices = @transform_4, window_bounds = array<i64: 1, 5>}, {transform_indices = @transform_5, window_bounds = array<i64: 2, 5>}]} {
    %c2_i32 = arith.constant 2 : i32
    %0 = arith.muli %arg0, %c2_i32 : i32
    %c0_i32 = arith.constant 0 : i32
    %1 = arith.addi %0, %c0_i32 : i32
    %2 = arith.index_cast %1 : i32 to index
    %c0 = arith.constant 0 : index
    %3 = memref.load %arg1[%2, %c0] : memref<2x12xi32, #tpu.memory_space<smem>>
    %4 = arith.index_cast %3 : i32 to index
    %c0_0 = arith.constant 0 : index
    %c0_1 = arith.constant 0 : index
    %5 = vector.load %arg2[%4, %c0_0, %c0_1] : memref<50x1x16xf32, #tpu.memory_space<vmem>>, vector<1x1x16xf32>
    %6 = vector.shape_cast %5 : vector<1x1x16xf32> to vector<1x16xf32>
    %c0_2 = arith.constant 0 : index
    %c0_3 = arith.constant 0 : index
    %7 = vector.load %arg8[%c0_2, %c0_3] : memref<2x192xf32, #tpu.memory_space<vmem>>, vector<1x16xf32>
    tpu.vector_store %arg8[%c0_2, %c0_3], %6 {strides = array<i32>} : memref<2x192xf32, #tpu.memory_space<vmem>>, vector<1x16xf32>,
    %c0_i32_4 = arith.constant 0 : i32
    %8 = arith.addi %0, %c0_i32_4 : i32
    %9 = arith.index_cast %8 : i32 to index
    %c1 = arith.constant 1 : index
    %10 = memref.load %arg1[%9, %c1] : memref<2x12xi32, #tpu.memory_space<smem>>
    %11 = arith.index_cast %10 : i32 to index
    %c0_5 = arith.constant 0 : index
    %c0_6 = arith.constant 0 : index
    %12 = vector.load %arg2[%11, %c0_5, %c0_6] : memref<50x1x16xf32, #tpu.memory_space<vmem>>, vector<1x1x16xf32>
    %13 = vector.shape_cast %12 : vector<1x1x16xf32> to vector<1x16xf32>
    %c0_7 = arith.constant 0 : index
    %c16 = arith.constant 16 : index
    %14 = vector.load %arg8[%c0_7, %c16] : memref<2x192xf32, #tpu.memory_space<vmem>>, vector<1x16xf32>
    tpu.vector_store %arg8[%c0_7, %c16], %13 {strides = array<i32>} : memref<2x192xf32, #tpu.memory_space<vmem>>, vector<1x16xf32>,
    %c0_i32_8 = arith.constant 0 : i32
    %15 = arith.addi %0, %c0_i32_8 : i32
    %16 = arith.index_cast %15 : i32 to index
    %c2 = arith.constant 2 : index
    %17 = memref.load %arg1[%16, %c2] : memref<2x12xi32, #tpu.memory_space<smem>>
    %18 = arith.index_cast %17 : i32 to index
    %c0_9 = arith.constant 0 : index
    %c0_10 = arith.constant 0 : index
    %19 = vector.load %arg2[%18, %c0_9, %c0_10] : memref<50x1x16xf32, #tpu.memory_space<vmem>>, vector<1x1x16xf32>
    %20 = vector.shape_cast %19 : vector<1x1x16xf32> to vector<1x16xf32>
    %c0_11 = arith.constant 0 : index
    %c32 = arith.constant 32 : index
    %21 = vector.load %arg8[%c0_11, %c32] : memref<2x192xf32, #tpu.memory_space<vmem>>, vector<1x16xf32>
    tpu.vector_store %arg8[%c0_11, %c32], %20 {strides = array<i32>} : memref<2x192xf32, #tpu.memory_space<vmem>>, vector<1x16xf32>,
    %c0_i32_12 = arith.constant 0 : i32
    %22 = arith.addi %0, %c0_i32_12 : i32
    %23 = arith.index_cast %22 : i32 to index
    %c3 = arith.constant 3 : index
    %24 = memref.load %arg1[%23, %c3] : memref<2x12xi32, #tpu.memory_space<smem>>
    %25 = arith.index_cast %24 : i32 to index
    %c0_13 = arith.constant 0 : index
    %c0_14 = arith.constant 0 : index
    %26 = vector.load %arg2[%25, %c0_13, %c0_14] : memref<50x1x16xf32, #tpu.memory_space<vmem>>, vector<1x1x16xf32>
    %27 = vector.shape_cast %26 : vector<1x1x16xf32> to vector<1x16xf32>
    %c0_15 = arith.constant 0 : index
    %c48 = arith.constant 48 : index
    %28 = vector.load %arg8[%c0_15, %c48] : memref<2x192xf32, #tpu.memory_space<vmem>>, vector<1x16xf32>
    tpu.vector_store %arg8[%c0_15, %c48], %27 {strides = array<i32>} : memref<2x192xf32, #tpu.memory_space<vmem>>, vector<1x16xf32>,
    %c0_i32_16 = arith.constant 0 : i32
    %29 = arith.addi %0, %c0_i32_16 : i32
    %30 = arith.index_cast %29 : i32 to index
    %c4 = arith.constant 4 : index
    %31 = memref.load %arg1[%30, %c4] : memref<2x12xi32, #tpu.memory_space<smem>>
    %32 = arith.index_cast %31 : i32 to index
    %c0_17 = arith.constant 0 : index
    %c0_18 = arith.constant 0 : index
    %33 = vector.load %arg2[%32, %c0_17, %c0_18] : memref<50x1x16xf32, #tpu.memory_space<vmem>>, vector<1x1x16xf32>
    %34 = vector.shape_cast %33 : vector<1x1x16xf32> to vector<1x16xf32>
    %c0_19 = arith.constant 0 : index
    %c64 = arith.constant 64 : index
    %35 = vector.load %arg8[%c0_19, %c64] : memref<2x192xf32, #tpu.memory_space<vmem>>, vector<1x16xf32>
    tpu.vector_store %arg8[%c0_19, %c64], %34 {strides = array<i32>} : memref<2x192xf32, #tpu.memory_space<vmem>>, vector<1x16xf32>,
    %c0_i32_20 = arith.constant 0 : i32
    %36 = arith.addi %0, %c0_i32_20 : i32
    %37 = arith.index_cast %36 : i32 to index
    %c5 = arith.constant 5 : index
    %38 = memref.load %arg1[%37, %c5] : memref<2x12xi32, #tpu.memory_space<smem>>
    %39 = arith.index_cast %38 : i32 to index
    %c0_21 = arith.constant 0 : index
    %c0_22 = arith.constant 0 : index
    %40 = vector.load %arg2[%39, %c0_21, %c0_22] : memref<50x1x16xf32, #tpu.memory_space<vmem>>, vector<1x1x16xf32>
    %41 = vector.shape_cast %40 : vector<1x1x16xf32> to vector<1x16xf32>
    %c0_23 = arith.constant 0 : index
    %c80 = arith.constant 80 : index
    %42 = vector.load %arg8[%c0_23, %c80] : memref<2x192xf32, #tpu.memory_space<vmem>>, vector<1x16xf32>
    tpu.vector_store %arg8[%c0_23, %c80], %41 {strides = array<i32>} : memref<2x192xf32, #tpu.memory_space<vmem>>, vector<1x16xf32>,
    %c0_i32_24 = arith.constant 0 : i32
    %43 = arith.addi %0, %c0_i32_24 : i32
    %44 = arith.index_cast %43 : i32 to index
    %c6 = arith.constant 6 : index
    %45 = memref.load %arg1[%44, %c6] : memref<2x12xi32, #tpu.memory_space<smem>>
    %46 = arith.index_cast %45 : i32 to index
    %c0_25 = arith.constant 0 : index
    %c0_26 = arith.constant 0 : index
    %47 = vector.load %arg2[%46, %c0_25, %c0_26] : memref<50x1x16xf32, #tpu.memory_space<vmem>>, vector<1x1x16xf32>
    %48 = vector.shape_cast %47 : vector<1x1x16xf32> to vector<1x16xf32>
    %c0_27 = arith.constant 0 : index
    %c96 = arith.constant 96 : index
    %49 = vector.load %arg8[%c0_27, %c96] : memref<2x192xf32, #tpu.memory_space<vmem>>, vector<1x16xf32>
    tpu.vector_store %arg8[%c0_27, %c96], %48 {strides = array<i32>} : memref<2x192xf32, #tpu.memory_space<vmem>>, vector<1x16xf32>,
    %c0_i32_28 = arith.constant 0 : i32
    %50 = arith.addi %0, %c0_i32_28 : i32
    %51 = arith.index_cast %50 : i32 to index
    %c7 = arith.constant 7 : index
    %52 = memref.load %arg1[%51, %c7] : memref<2x12xi32, #tpu.memory_space<smem>>
    %53 = arith.index_cast %52 : i32 to index
    %c0_29 = arith.constant 0 : index
    %c0_30 = arith.constant 0 : index
    %54 = vector.load %arg2[%53, %c0_29, %c0_30] : memref<50x1x16xf32, #tpu.memory_space<vmem>>, vector<1x1x16xf32>
    %55 = vector.shape_cast %54 : vector<1x1x16xf32> to vector<1x16xf32>
    %c0_31 = arith.constant 0 : index
    %c112 = arith.constant 112 : index
    %56 = vector.load %arg8[%c0_31, %c112] : memref<2x192xf32, #tpu.memory_space<vmem>>, vector<1x16xf32>
    tpu.vector_store %arg8[%c0_31, %c112], %55 {strides = array<i32>} : memref<2x192xf32, #tpu.memory_space<vmem>>, vector<1x16xf32>,
    %c0_i32_32 = arith.constant 0 : i32
    %57 = arith.addi %0, %c0_i32_32 : i32
    %58 = arith.index_cast %57 : i32 to index
    %c8 = arith.constant 8 : index
    %59 = memref.load %arg1[%58, %c8] : memref<2x12xi32, #tpu.memory_space<smem>>
    %60 = arith.index_cast %59 : i32 to index
    %c0_33 = arith.constant 0 : index
    %c0_34 = arith.constant 0 : index
    %61 = vector.load %arg2[%60, %c0_33, %c0_34] : memref<50x1x16xf32, #tpu.memory_space<vmem>>, vector<1x1x16xf32>
    %62 = vector.shape_cast %61 : vector<1x1x16xf32> to vector<1x16xf32>
    %c0_35 = arith.constant 0 : index
    %c128 = arith.constant 128 : index
    %63 = vector.load %arg8[%c0_35, %c128] : memref<2x192xf32, #tpu.memory_space<vmem>>, vector<1x16xf32>
    tpu.vector_store %arg8[%c0_35, %c128], %62 {strides = array<i32>} : memref<2x192xf32, #tpu.memory_space<vmem>>, vector<1x16xf32>,
    %c0_i32_36 = arith.constant 0 : i32
    %64 = arith.addi %0, %c0_i32_36 : i32
    %65 = arith.index_cast %64 : i32 to index
    %c9 = arith.constant 9 : index
    %66 = memref.load %arg1[%65, %c9] : memref<2x12xi32, #tpu.memory_space<smem>>
    %67 = arith.index_cast %66 : i32 to index
    %c0_37 = arith.constant 0 : index
    %c0_38 = arith.constant 0 : index
    %68 = vector.load %arg2[%67, %c0_37, %c0_38] : memref<50x1x16xf32, #tpu.memory_space<vmem>>, vector<1x1x16xf32>
    %69 = vector.shape_cast %68 : vector<1x1x16xf32> to vector<1x16xf32>
    %c0_39 = arith.constant 0 : index
    %c144 = arith.constant 144 : index
    %70 = vector.load %arg8[%c0_39, %c144] : memref<2x192xf32, #tpu.memory_space<vmem>>, vector<1x16xf32>
    tpu.vector_store %arg8[%c0_39, %c144], %69 {strides = array<i32>} : memref<2x192xf32, #tpu.memory_space<vmem>>, vector<1x16xf32>,
    %c0_i32_40 = arith.constant 0 : i32
    %71 = arith.addi %0, %c0_i32_40 : i32
    %72 = arith.index_cast %71 : i32 to index
    %c10 = arith.constant 10 : index
    %73 = memref.load %arg1[%72, %c10] : memref<2x12xi32, #tpu.memory_space<smem>>
    %74 = arith.index_cast %73 : i32 to index
    %c0_41 = arith.constant 0 : index
    %c0_42 = arith.constant 0 : index
    %75 = vector.load %arg2[%74, %c0_41, %c0_42] : memref<50x1x16xf32, #tpu.memory_space<vmem>>, vector<1x1x16xf32>
    %76 = vector.shape_cast %75 : vector<1x1x16xf32> to vector<1x16xf32>
    %c0_43 = arith.constant 0 : index
    %c160 = arith.constant 160 : index
    %77 = vector.load %arg8[%c0_43, %c160] : memref<2x192xf32, #tpu.memory_space<vmem>>, vector<1x16xf32>
    tpu.vector_store %arg8[%c0_43, %c160], %76 {strides = array<i32>} : memref<2x192xf32, #tpu.memory_space<vmem>>, vector<1x16xf32>,
    %c0_i32_44 = arith.constant 0 : i32
    %78 = arith.addi %0, %c0_i32_44 : i32
    %79 = arith.index_cast %78 : i32 to index
    %c11 = arith.constant 11 : index
    %80 = memref.load %arg1[%79, %c11] : memref<2x12xi32, #tpu.memory_space<smem>>
    %81 = arith.index_cast %80 : i32 to index
    %c0_45 = arith.constant 0 : index
    %c0_46 = arith.constant 0 : index
    %82 = vector.load %arg2[%81, %c0_45, %c0_46] : memref<50x1x16xf32, #tpu.memory_space<vmem>>, vector<1x1x16xf32>
    %83 = vector.shape_cast %82 : vector<1x1x16xf32> to vector<1x16xf32>
    %c0_47 = arith.constant 0 : index
    %c176 = arith.constant 176 : index
    %84 = vector.load %arg8[%c0_47, %c176] : memref<2x192xf32, #tpu.memory_space<vmem>>, vector<1x16xf32>
    tpu.vector_store %arg8[%c0_47, %c176], %83 {strides = array<i32>} : memref<2x192xf32, #tpu.memory_space<vmem>>, vector<1x16xf32>,
    %c1_i32 = arith.constant 1 : i32
    %85 = arith.addi %0, %c1_i32 : i32
    %86 = arith.index_cast %85 : i32 to index
    %c0_48 = arith.constant 0 : index
    %87 = memref.load %arg1[%86, %c0_48] : memref<2x12xi32, #tpu.memory_space<smem>>
    %88 = arith.index_cast %87 : i32 to index
    %c0_49 = arith.constant 0 : index
    %c0_50 = arith.constant 0 : index
    %89 = vector.load %arg2[%88, %c0_49, %c0_50] : memref<50x1x16xf32, #tpu.memory_space<vmem>>, vector<1x1x16xf32>
    %90 = vector.shape_cast %89 : vector<1x1x16xf32> to vector<1x16xf32>
    %c1_51 = arith.constant 1 : index
    %c0_52 = arith.constant 0 : index
    %91 = vector.load %arg8[%c1_51, %c0_52] : memref<2x192xf32, #tpu.memory_space<vmem>>, vector<1x16xf32>
    tpu.vector_store %arg8[%c1_51, %c0_52], %90 {strides = array<i32>} : memref<2x192xf32, #tpu.memory_space<vmem>>, vector<1x16xf32>,
    %c1_i32_53 = arith.constant 1 : i32
    %92 = arith.addi %0, %c1_i32_53 : i32
    %93 = arith.index_cast %92 : i32 to index
    %c1_54 = arith.constant 1 : index
    %94 = memref.load %arg1[%93, %c1_54] : memref<2x12xi32, #tpu.memory_space<smem>>
    %95 = arith.index_cast %94 : i32 to index
    %c0_55 = arith.constant 0 : index
    %c0_56 = arith.constant 0 : index
    %96 = vector.load %arg2[%95, %c0_55, %c0_56] : memref<50x1x16xf32, #tpu.memory_space<vmem>>, vector<1x1x16xf32>
    %97 = vector.shape_cast %96 : vector<1x1x16xf32> to vector<1x16xf32>
    %c1_57 = arith.constant 1 : index
    %c16_58 = arith.constant 16 : index
    %98 = vector.load %arg8[%c1_57, %c16_58] : memref<2x192xf32, #tpu.memory_space<vmem>>, vector<1x16xf32>
    tpu.vector_store %arg8[%c1_57, %c16_58], %97 {strides = array<i32>} : memref<2x192xf32, #tpu.memory_space<vmem>>, vector<1x16xf32>,
    %c1_i32_59 = arith.constant 1 : i32
    %99 = arith.addi %0, %c1_i32_59 : i32
    %100 = arith.index_cast %99 : i32 to index
    %c2_60 = arith.constant 2 : index
    %101 = memref.load %arg1[%100, %c2_60] : memref<2x12xi32, #tpu.memory_space<smem>>
    %102 = arith.index_cast %101 : i32 to index
    %c0_61 = arith.constant 0 : index
    %c0_62 = arith.constant 0 : index
    %103 = vector.load %arg2[%102, %c0_61, %c0_62] : memref<50x1x16xf32, #tpu.memory_space<vmem>>, vector<1x1x16xf32>
    %104 = vector.shape_cast %103 : vector<1x1x16xf32> to vector<1x16xf32>
    %c1_63 = arith.constant 1 : index
    %c32_64 = arith.constant 32 : index
    %105 = vector.load %arg8[%c1_63, %c32_64] : memref<2x192xf32, #tpu.memory_space<vmem>>, vector<1x16xf32>
    tpu.vector_store %arg8[%c1_63, %c32_64], %104 {strides = array<i32>} : memref<2x192xf32, #tpu.memory_space<vmem>>, vector<1x16xf32>,
    %c1_i32_65 = arith.constant 1 : i32
    %106 = arith.addi %0, %c1_i32_65 : i32
    %107 = arith.index_cast %106 : i32 to index
    %c3_66 = arith.constant 3 : index
    %108 = memref.load %arg1[%107, %c3_66] : memref<2x12xi32, #tpu.memory_space<smem>>
    %109 = arith.index_cast %108 : i32 to index
    %c0_67 = arith.constant 0 : index
    %c0_68 = arith.constant 0 : index
    %110 = vector.load %arg2[%109, %c0_67, %c0_68] : memref<50x1x16xf32, #tpu.memory_space<vmem>>, vector<1x1x16xf32>
    %111 = vector.shape_cast %110 : vector<1x1x16xf32> to vector<1x16xf32>
    %c1_69 = arith.constant 1 : index
    %c48_70 = arith.constant 48 : index
    %112 = vector.load %arg8[%c1_69, %c48_70] : memref<2x192xf32, #tpu.memory_space<vmem>>, vector<1x16xf32>
    tpu.vector_store %arg8[%c1_69, %c48_70], %111 {strides = array<i32>} : memref<2x192xf32, #tpu.memory_space<vmem>>, vector<1x16xf32>,
    %c1_i32_71 = arith.constant 1 : i32
    %113 = arith.addi %0, %c1_i32_71 : i32
    %114 = arith.index_cast %113 : i32 to index
    %c4_72 = arith.constant 4 : index
    %115 = memref.load %arg1[%114, %c4_72] : memref<2x12xi32, #tpu.memory_space<smem>>
    %116 = arith.index_cast %115 : i32 to index
    %c0_73 = arith.constant 0 : index
    %c0_74 = arith.constant 0 : index
    %117 = vector.load %arg2[%116, %c0_73, %c0_74] : memref<50x1x16xf32, #tpu.memory_space<vmem>>, vector<1x1x16xf32>
    %118 = vector.shape_cast %117 : vector<1x1x16xf32> to vector<1x16xf32>
    %c1_75 = arith.constant 1 : index
    %c64_76 = arith.constant 64 : index
    %119 = vector.load %arg8[%c1_75, %c64_76] : memref<2x192xf32, #tpu.memory_space<vmem>>, vector<1x16xf32>
    tpu.vector_store %arg8[%c1_75, %c64_76], %118 {strides = array<i32>} : memref<2x192xf32, #tpu.memory_space<vmem>>, vector<1x16xf32>,
    %c1_i32_77 = arith.constant 1 : i32
    %120 = arith.addi %0, %c1_i32_77 : i32
    %121 = arith.index_cast %120 : i32 to index
    %c5_78 = arith.constant 5 : index
    %122 = memref.load %arg1[%121, %c5_78] : memref<2x12xi32, #tpu.memory_space<smem>>
    %123 = arith.index_cast %122 : i32 to index
    %c0_79 = arith.constant 0 : index
    %c0_80 = arith.constant 0 : index
    %124 = vector.load %arg2[%123, %c0_79, %c0_80] : memref<50x1x16xf32, #tpu.memory_space<vmem>>, vector<1x1x16xf32>
    %125 = vector.shape_cast %124 : vector<1x1x16xf32> to vector<1x16xf32>
    %c1_81 = arith.constant 1 : index
    %c80_82 = arith.constant 80 : index
    %126 = vector.load %arg8[%c1_81, %c80_82] : memref<2x192xf32, #tpu.memory_space<vmem>>, vector<1x16xf32>
    tpu.vector_store %arg8[%c1_81, %c80_82], %125 {strides = array<i32>} : memref<2x192xf32, #tpu.memory_space<vmem>>, vector<1x16xf32>,
    %c1_i32_83 = arith.constant 1 : i32
    %127 = arith.addi %0, %c1_i32_83 : i32
    %128 = arith.index_cast %127 : i32 to index
    %c6_84 = arith.constant 6 : index
    %129 = memref.load %arg1[%128, %c6_84] : memref<2x12xi32, #tpu.memory_space<smem>>
    %130 = arith.index_cast %129 : i32 to index
    %c0_85 = arith.constant 0 : index
    %c0_86 = arith.constant 0 : index
    %131 = vector.load %arg2[%130, %c0_85, %c0_86] : memref<50x1x16xf32, #tpu.memory_space<vmem>>, vector<1x1x16xf32>
    %132 = vector.shape_cast %131 : vector<1x1x16xf32> to vector<1x16xf32>
    %c1_87 = arith.constant 1 : index
    %c96_88 = arith.constant 96 : index
    %133 = vector.load %arg8[%c1_87, %c96_88] : memref<2x192xf32, #tpu.memory_space<vmem>>, vector<1x16xf32>
    tpu.vector_store %arg8[%c1_87, %c96_88], %132 {strides = array<i32>} : memref<2x192xf32, #tpu.memory_space<vmem>>, vector<1x16xf32>,
    %c1_i32_89 = arith.constant 1 : i32
    %134 = arith.addi %0, %c1_i32_89 : i32
    %135 = arith.index_cast %134 : i32 to index
    %c7_90 = arith.constant 7 : index
    %136 = memref.load %arg1[%135, %c7_90] : memref<2x12xi32, #tpu.memory_space<smem>>
    %137 = arith.index_cast %136 : i32 to index
    %c0_91 = arith.constant 0 : index
    %c0_92 = arith.constant 0 : index
    %138 = vector.load %arg2[%137, %c0_91, %c0_92] : memref<50x1x16xf32, #tpu.memory_space<vmem>>, vector<1x1x16xf32>
    %139 = vector.shape_cast %138 : vector<1x1x16xf32> to vector<1x16xf32>
    %c1_93 = arith.constant 1 : index
    %c112_94 = arith.constant 112 : index
    %140 = vector.load %arg8[%c1_93, %c112_94] : memref<2x192xf32, #tpu.memory_space<vmem>>, vector<1x16xf32>
    tpu.vector_store %arg8[%c1_93, %c112_94], %139 {strides = array<i32>} : memref<2x192xf32, #tpu.memory_space<vmem>>, vector<1x16xf32>,
    %c1_i32_95 = arith.constant 1 : i32
    %141 = arith.addi %0, %c1_i32_95 : i32
    %142 = arith.index_cast %141 : i32 to index
    %c8_96 = arith.constant 8 : index
    %143 = memref.load %arg1[%142, %c8_96] : memref<2x12xi32, #tpu.memory_space<smem>>
    %144 = arith.index_cast %143 : i32 to index
    %c0_97 = arith.constant 0 : index
    %c0_98 = arith.constant 0 : index
    %145 = vector.load %arg2[%144, %c0_97, %c0_98] : memref<50x1x16xf32, #tpu.memory_space<vmem>>, vector<1x1x16xf32>
    %146 = vector.shape_cast %145 : vector<1x1x16xf32> to vector<1x16xf32>
    %c1_99 = arith.constant 1 : index
    %c128_100 = arith.constant 128 : index
    %147 = vector.load %arg8[%c1_99, %c128_100] : memref<2x192xf32, #tpu.memory_space<vmem>>, vector<1x16xf32>
    tpu.vector_store %arg8[%c1_99, %c128_100], %146 {strides = array<i32>} : memref<2x192xf32, #tpu.memory_space<vmem>>, vector<1x16xf32>,
    %c1_i32_101 = arith.constant 1 : i32
    %148 = arith.addi %0, %c1_i32_101 : i32
    %149 = arith.index_cast %148 : i32 to index
    %c9_102 = arith.constant 9 : index
    %150 = memref.load %arg1[%149, %c9_102] : memref<2x12xi32, #tpu.memory_space<smem>>
    %151 = arith.index_cast %150 : i32 to index
    %c0_103 = arith.constant 0 : index
    %c0_104 = arith.constant 0 : index
    %152 = vector.load %arg2[%151, %c0_103, %c0_104] : memref<50x1x16xf32, #tpu.memory_space<vmem>>, vector<1x1x16xf32>
    %153 = vector.shape_cast %152 : vector<1x1x16xf32> to vector<1x16xf32>
    %c1_105 = arith.constant 1 : index
    %c144_106 = arith.constant 144 : index
    %154 = vector.load %arg8[%c1_105, %c144_106] : memref<2x192xf32, #tpu.memory_space<vmem>>, vector<1x16xf32>
    tpu.vector_store %arg8[%c1_105, %c144_106], %153 {strides = array<i32>} : memref<2x192xf32, #tpu.memory_space<vmem>>, vector<1x16xf32>,
    %c1_i32_107 = arith.constant 1 : i32
    %155 = arith.addi %0, %c1_i32_107 : i32
    %156 = arith.index_cast %155 : i32 to index
    %c10_108 = arith.constant 10 : index
    %157 = memref.load %arg1[%156, %c10_108] : memref<2x12xi32, #tpu.memory_space<smem>>
    %158 = arith.index_cast %157 : i32 to index
    %c0_109 = arith.constant 0 : index
    %c0_110 = arith.constant 0 : index
    %159 = vector.load %arg2[%158, %c0_109, %c0_110] : memref<50x1x16xf32, #tpu.memory_space<vmem>>, vector<1x1x16xf32>
    %160 = vector.shape_cast %159 : vector<1x1x16xf32> to vector<1x16xf32>
    %c1_111 = arith.constant 1 : index
    %c160_112 = arith.constant 160 : index
    %161 = vector.load %arg8[%c1_111, %c160_112] : memref<2x192xf32, #tpu.memory_space<vmem>>, vector<1x16xf32>
    tpu.vector_store %arg8[%c1_111, %c160_112], %160 {strides = array<i32>} : memref<2x192xf32, #tpu.memory_space<vmem>>, vector<1x16xf32>,
    %c1_i32_113 = arith.constant 1 : i32
    %162 = arith.addi %0, %c1_i32_113 : i32
    %163 = arith.index_cast %162 : i32 to index
    %c11_114 = arith.constant 11 : index
    %164 = memref.load %arg1[%163, %c11_114] : memref<2x12xi32, #tpu.memory_space<smem>>
    %165 = arith.index_cast %164 : i32 to index
    %c0_115 = arith.constant 0 : index
    %c0_116 = arith.constant 0 : index
    %166 = vector.load %arg2[%165, %c0_115, %c0_116] : memref<50x1x16xf32, #tpu.memory_space<vmem>>, vector<1x1x16xf32>
    %167 = vector.shape_cast %166 : vector<1x1x16xf32> to vector<1x16xf32>
    %c1_117 = arith.constant 1 : index
    %c176_118 = arith.constant 176 : index
    %168 = vector.load %arg8[%c1_117, %c176_118] : memref<2x192xf32, #tpu.memory_space<vmem>>, vector<1x16xf32>
    tpu.vector_store %arg8[%c1_117, %c176_118], %167 {strides = array<i32>} : memref<2x192xf32, #tpu.memory_space<vmem>>, vector<1x16xf32>,
    %c0_119 = arith.constant 0 : index
    %c0_120 = arith.constant 0 : index
    %169 = vector.load %arg8[%c0_119, %c0_120] : memref<2x192xf32, #tpu.memory_space<vmem>>, vector<2x160xf32>
    %c0_121 = arith.constant 0 : index
    %c16_122 = arith.constant 16 : index
    %170 = vector.load %arg8[%c0_121, %c16_122] : memref<2x192xf32, #tpu.memory_space<vmem>>, vector<2x160xf32>
    %171 = arith.maximumf %169, %170 : vector<2x160xf32>
    %c0_123 = arith.constant 0 : index
    %c32_124 = arith.constant 32 : index
    %172 = vector.load %arg8[%c0_123, %c32_124] : memref<2x192xf32, #tpu.memory_space<vmem>>, vector<2x160xf32>
    %173 = arith.maximumf %171, %172 : vector<2x160xf32>
    %c0_125 = arith.constant 0 : index
    %c0_126 = arith.constant 0 : index
    %174 = vector.load %arg3[%c0_125, %c0_126] : memref<160x32xf32, #tpu.memory_space<vmem>>, vector<160x32xf32>
    %cst = arith.constant dense<0.000000e+00> : vector<2x32xf32>
    %175 = tpu.matmul %173, %174, %cst {dimension_numbers = #tpu.dot_dimension_numbers<[1], [0], [0], [1], [0, 0, 1, 1], [], []>} : vector<2x160xf32>, vector<160x32xf32>, vector<2x32xf32> -> vector<2x32xf32>
    %c0_127 = arith.constant 0 : index
    %c0_128 = arith.constant 0 : index
    %176 = vector.load %arg4[%c0_127, %c0_128] : memref<1x32xf32, #tpu.memory_space<vmem>>, vector<1x32xf32>
    %177 = vector.broadcast %176 : vector<1x32xf32> to vector<2x32xf32>
    %178 = arith.addf %175, %177 : vector<2x32xf32>
    %cst_129 = arith.constant 0.000000e+00 : f32
    %179 = vector.broadcast %cst_129 : f32 to vector<2x32xf32>
    %180 = arith.maximumf %178, %179 : vector<2x32xf32>
    %c0_130 = arith.constant 0 : index
    %c0_131 = arith.constant 0 : index
    %181 = vector.load %arg5[%c0_130, %c0_131] : memref<32x5xf32, #tpu.memory_space<vmem>>, vector<32x5xf32>
    %cst_132 = arith.constant dense<0.000000e+00> : vector<2x5xf32>
    %182 = tpu.matmul %180, %181, %cst_132 {dimension_numbers = #tpu.dot_dimension_numbers<[1], [0], [0], [1], [0, 0, 1, 1], [], []>} : vector<2x32xf32>, vector<32x5xf32>, vector<2x5xf32> -> vector<2x5xf32>
    %c0_133 = arith.constant 0 : index
    %c0_134 = arith.constant 0 : index
    %183 = vector.load %arg6[%c0_133, %c0_134] : memref<1x5xf32, #tpu.memory_space<vmem>>, vector<1x5xf32>
    %184 = vector.broadcast %183 : vector<1x5xf32> to vector<2x5xf32>
    %185 = arith.addf %182, %184 : vector<2x5xf32>
    %c0_135 = arith.constant 0 : index
    %c0_136 = arith.constant 0 : index
    %186 = vector.load %arg7[%c0_135, %c0_136] : memref<2x5xf32, #tpu.memory_space<vmem>>, vector<2x5xf32>
    tpu.vector_store %arg7[%c0_135, %c0_136], %185 {strides = array<i32>} : memref<2x5xf32, #tpu.memory_space<vmem>>, vector<2x5xf32>,
    return
  }
  func.func @transform_0(%arg0: i32, %arg1: memref<2x12xi32, #tpu.memory_space<smem>>) -> (i32, i32, i32) {
    %c0_i32 = arith.constant 0 : i32
    %c0_i32_0 = arith.constant 0 : i32
    %c0_i32_1 = arith.constant 0 : i32
    %c0_i32_2 = arith.constant 0 : i32
    return %c0_i32, %c0_i32_0, %c0_i32_1 : i32, i32, i32
  }
  func.func @transform_1(%arg0: i32, %arg1: memref<2x12xi32, #tpu.memory_space<smem>>) -> (i32, i32) {
    %c0_i32 = arith.constant 0 : i32
    %c0_i32_0 = arith.constant 0 : i32
    %c0_i32_1 = arith.constant 0 : i32
    return %c0_i32, %c0_i32_0 : i32, i32
  }
  func.func @transform_2(%arg0: i32, %arg1: memref<2x12xi32, #tpu.memory_space<smem>>) -> (i32, i32) {
    %c0_i32 = arith.constant 0 : i32
    %c0_i32_0 = arith.constant 0 : i32
    %c0_i32_1 = arith.constant 0 : i32
    return %c0_i32, %c0_i32_0 : i32, i32
  }
  func.func @transform_3(%arg0: i32, %arg1: memref<2x12xi32, #tpu.memory_space<smem>>) -> (i32, i32) {
    %c0_i32 = arith.constant 0 : i32
    %c0_i32_0 = arith.constant 0 : i32
    %c0_i32_1 = arith.constant 0 : i32
    return %c0_i32, %c0_i32_0 : i32, i32
  }
  func.func @transform_4(%arg0: i32, %arg1: memref<2x12xi32, #tpu.memory_space<smem>>) -> (i32, i32) {
    %c0_i32 = arith.constant 0 : i32
    %c0_i32_0 = arith.constant 0 : i32
    %c0_i32_1 = arith.constant 0 : i32
    return %c0_i32, %c0_i32_0 : i32, i32
  }
  func.func @transform_5(%arg0: i32, %arg1: memref<2x12xi32, #tpu.memory_space<smem>>) -> (i32, i32) {
    %c0_i32 = arith.constant 0 : i32
    %c0_i32_0 = arith.constant 0 : i32
    return %arg0, %c0_i32 : i32, i32
  }
}

</mosaic_0001>

<bundles_post_ra>
// kernel: tpu_custom_call.1
= control target key start
LH: loop header
LB: loop body
LE: loop exit
PB: predicated region body
PF: predicated region fallthrough
CT: control target
= control target key end

     0   :  { %s559_s24 = smov [#allocation4]   ;;  %s823_s0 = inlined_call_operand.vmem [shape: s32[2,12], index: 0, kind: input, shape index: {}]   ;;  %s824_s1 = inlined_call_operand.vmem [shape: f32[50,1,16], index: 1, kind: input, shape index: {}]   ;;  %s825_s2 = inlined_call_operand.vmem [shape: f32[160,32], index: 2, kind: input, shape index: {}]   ;;  %s826_s3 = inlined_call_operand.vmem [shape: f32[1,32], index: 3, kind: input, shape index: {}]   ;;  %s827_s4 = inlined_call_operand.vmem [shape: f32[32,5], index: 4, kind: input, shape index: {}]   ;;  %s828_s5 = inlined_call_operand.vmem [shape: f32[1,5], index: 5, kind: input, shape index: {}]   ;;  %s829_s6 = inlined_call_operand.hbm [shape: f32[2,5], index: 6, kind: output, shape index: {}]  }
   0x1   :  { %s12_s23 = sshll.u32 %s823_s0, 4  ;;  %s13_s23 = int_to_ptr.vmem [resolvable:$true] %s12_s23 }
   0x2   :  { %15 = dma.vmem_to_smem %s13_s23, 32, %s559_s24, [#allocation3] }
   0x3   :  { %555 = dma.done.wait [#allocation3], 32 }
   0x4   :  { %556 = vsyncadd [#allocation3], 4294967264 }
   0x5   :  { %18 = sfence }
   0x6   :  { %s483_s25 = sld [smem:[#allocation4 + $0x2]]  ;;  %v560_v0 = vmov 857870592  }
   0x7   :  { %v43_v1 = vunpack.c.l.s4 %v560_v0  ;;  %s482_s26 = sld [smem:[#allocation4 + $0x1]] }
   0x8   :  { %s495_s27 = sld [smem:[#allocation4 + $0x82]] }
   0x9   :  { %s494_s28 = sld [smem:[#allocation4 + $0x81]] }
   0xa   :  { %19 = vsyncpa [#allocation6], 0  ;;  %v607_v2 = vunpack.c.0.s8 %v43_v1  ;;  %s615_s10 = sld [smem:[#allocation4 + $0x84]]  ;;  %s561_s19 = smov 32   ;;  %vm35_vm0 = vcmask 122880   ;;  %vm49_vm1 = vcmask 254080  }
   0xb   :  { %s484_s14 = sld [smem:[#allocation4 + $0x3]]  ;;  %s562_s20 = smov 16   ;;  %vm63_vm2 = vcmask 385280   ;;  %vm77_vm3 = vcmask 516480   ;;  %vm91_vm4 = vcmask 647680   ;;  %vm105_vm5 = vcmask 778880  }
   0xc   :  { %s53_s7 = scalar_lea.vmem %s824_s1, %s483_s25  ;;  %s485_s18 = sld [smem:[#allocation4 + $0x4]]  ;;  %vm119_vm6 = vcmask 910080   ;;  %vm133_vm7 = vcmask 1041280   ;;  %vm325_vm8 = vcmask 916480   ;;  %vm332_vm9 = vcmask 785408  }
   0xd   :  { %v54_v3 = vld [vmem:[%s53_s7] sm:$0x1]  ;;  %s39_s9 = scalar_lea.vmem %s824_s1, %s482_s26  ;;  %s496_s21 = sld [smem:[#allocation4 + $0x83]]  ;;  %vm365_vm10 = vcmask 261120   ;;  %vm440_vm11 = vcmask 33792  }
   0xe   :  { %v59_v4 = vperm.slane %v54_v3, %v607_v2  ;;  %v40_v5 = vld [vmem:[%s39_s9] sm:$0x1]  ;;  %s200_s13 = scalar_lea.vmem %s824_s1, %s495_s27  ;;  %s628_s22 = sld [smem:[#allocation4 + $0x85]] }
   0xf   :  { %v45_v6 = vperm.slane %v40_v5, %v607_v2  ;;  %s187_s17 = scalar_lea.vmem %s824_s1, %s494_s28  ;;  %v201_v7 = vld [vmem:[%s200_s13] sm:$0x1]  ;;  %s634_s26 = sld [smem:[#allocation4 + $0x9]]  ;;  %v350_v5 = vld [vmem:[%s825_s2 + $0x70] sm:$0xff] }
  0x10   :  { %60 = vrot.lane.b32.xlu1 %v59_v4, %s561_s19  ;;  %v188_v8 = vld [vmem:[%s187_s17] sm:$0x1]  ;;  %v206_v9 = vperm.slane %v201_v7, %v607_v2  ;;  %s226_s29 = scalar_lea.vmem %s824_s1, %s615_s10  ;;  %s486_s30 = sld [smem:[#allocation4 + $0x5]]  ;;  %v351_v4 = vld [vmem:[%s825_s2 + $0x78] sm:$0xff] }
  0x11   :  { %46 = vrot.lane.b32.xlu0 %v45_v6, %s562_s20  ;;  %s67_s25 = scalar_lea.vmem %s824_s1, %s484_s14  ;;  %v193_v10 = vperm.slane %v188_v8, %v607_v2  ;;  %s563_s13 = smov 48   ;;  %v227_v13 = vld [vmem:[%s226_s29] sm:$0x1]  ;;  %368 = vmatpush.msra.mxu0 %v351_v4  ;;  %v349_v6 = vld [vmem:[%s825_s2 + $0x68] sm:$0xff]  ;;  %v347_v8 = vld [vmem:[%s825_s2 + $0x58] sm:$0xff] }
  0x12   :  { %v68_v11 = vld [vmem:[%s67_s25] sm:$0x1]  ;;  %s81_s8 = scalar_lea.vmem %s824_s1, %s485_s18  ;;  %v232_v16 = vperm.slane %v227_v13, %v607_v2  ;;  %s491_s16 = sld [smem:[#allocation4 + $0xa]]  ;;  %v342_v13 = vld [vmem:[%s825_s2 + $0x30] sm:$0xff] }
  0x13   :  { %v73_v12 = vperm.slane %v68_v11, %v607_v2  ;;  %s213_s12 = scalar_lea.vmem %s824_s1, %s496_s21  ;;  %v82_v15 = vld [vmem:[%s81_s8] sm:$0x1]  ;;  %s502_s23 = sld [smem:[#allocation4 + $0x89]]  ;;  %369 = vmatpush.msra.mxu0 %v350_v5 }
  0x14   :  { %v214_v14 = vld [vmem:[%s213_s12] sm:$0x1]  ;;  %v87_v18 = vperm.slane %v82_v15, %v607_v2  ;;  %s239_s15 = scalar_lea.vmem %s824_s1, %s628_s22  ;;  %s487_s28 = sld [smem:[#allocation4 + $0x6]] }
  0x15   :  { %74 = vrot.lane.b32.xlu2 %v73_v12, %s563_s13  ;;  %v219_v17 = vperm.slane %v214_v14, %v607_v2  ;;  %s142_s27 = scalar_lea.vmem %s824_s1, %s634_s26  ;;  %s564_s29 = smov 64   ;;  %v240_v19 = vld [vmem:[%s239_s15] sm:$0x1]  ;;  %370 = vmatpush.msra.mxu0 %v349_v6  ;;  %v343_v12 = vld [vmem:[%s825_s2 + $0x38] sm:$0xff]  ;;  %v341_v14 = vld [vmem:[%s825_s2 + $0x28] sm:$0xff] }
  0x16   :  { %s95_s21 = scalar_lea.vmem %s824_s1, %s486_s30  ;;  %v143_v21 = vld [vmem:[%s142_s27] sm:$0x1]  ;;  %v245_v22 = vperm.slane %v240_v19, %v607_v2  ;;  %s488_s26 = sld [smem:[#allocation4 + $0x7]]  ;;  %v354_v19 = vld [vmem:[%s825_s2 + $0x90] sm:$0xff] }
  0x17   :  { %v96_v20 = vld [vmem:[%s95_s21] sm:$0x1]  ;;  %v148_v24 = vperm.slane %v143_v21, %v607_v2  ;;  %s499_s11 = sld [smem:[#allocation4 + $0x86]]  ;;  %s565_s17 = smov 80   ;;  %v353_v21 = vld [vmem:[%s825_s2 + $0x88] sm:$0xff] }
  0x18   :  { %207 = vrot.lane.b32.xlu1 %v206_v9, %s561_s19  ;;  %v101_v23 = vperm.slane %v96_v20, %v607_v2  ;;  %s155_s7 = scalar_lea.vmem %s824_s1, %s491_s16  ;;  %s503_s15 = sld [smem:[#allocation4 + $0x8a]]  ;;  %v348_v7 = vld [vmem:[%s825_s2 + $0x60] sm:$0xff]  ;;  %v346_v9 = vld [vmem:[%s825_s2 + $0x50] sm:$0xff]  ;;  %v337_v20 = vld [vmem:[%s825_s2 + $0x8] sm:$0xff] }
  0x19   :  { %194 = vrot.lane.b32.xlu0 %v193_v10, %s562_s20  ;;  %s283_s9 = scalar_lea.vmem %s824_s1, %s502_s23  ;;  %v156_v25 = vld [vmem:[%s155_s7] sm:$0x1]  ;;  %s504_s23 = sld [smem:[#allocation4 + $0x8b]]  ;;  %371 = vmatpush.msra.mxu0 %v348_v7  ;;  %v345_v10 = vld [vmem:[%s825_s2 + $0x48] sm:$0xff] }
  0x1a   :  { %s109_s14 = scalar_lea.vmem %s824_s1, %s487_s28  ;;  %v284_v26 = vld [vmem:[%s283_s9] sm:$0x1]  ;;  %v161_v28 = vperm.slane %v156_v25, %v607_v2  ;;  %s492_s28 = sld [smem:[#allocation4 + $0xb]] }
  0x1b   :  { %v110_v27 = vld [vmem:[%s109_s14] sm:$0x1]  ;;  %v289_v29 = vperm.slane %v284_v26, %v607_v2  ;;  %s500_s7 = sld [smem:[#allocation4 + $0x87]]  ;;  %s566_s0 = smov 96   ;;  %372 = vmatpush.msra.mxu0 %v347_v8 }
  0x1c   :  { %v115_v30 = vperm.slane %v110_v27, %v607_v2  ;;  %s123_s21 = scalar_lea.vmem %s824_s1, %s488_s26  ;;  %s32_s16 = sld [smem:[#allocation4]]  ;;  %v344_v11 = vld [vmem:[%s825_s2 + $0x40] sm:$0xff] }
  0x1d   :  { %220 = vrot.lane.b32.xlu2 %v219_v17, %s563_s13  ;;  %s252_s27 = scalar_lea.vmem %s824_s1, %s499_s11  ;;  %v124_v31 = vld [vmem:[%s123_s21] sm:$0x1]  ;;  %373 = vmatpush.msra.mxu0 %v346_v9  ;;  %v355_v17 = vld [vmem:[%s825_s2 + $0x98] sm:$0xff]  ;;  %s449_s11 = sshll.u32 %s829_s6, 4  ;;  %s450_s11 = int_to_ptr.hbm [resolvable:$true] %s449_s11 }
  0x1e   :  { %s296_s30 = scalar_lea.vmem %s824_s1, %s503_s15  ;;  %v253_v32 = vld [vmem:[%s252_s27] sm:$0x1]  ;;  %v129_v34 = vperm.slane %v124_v31, %v607_v2  ;;  %400 = vmatpush.msra.mxu1 %v355_v17 }
  0x1f   :  { %v297_v33 = vld [vmem:[%s296_s30] sm:$0x1]  ;;  %v258_v35 = vperm.slane %v253_v32, %v607_v2  ;;  %s309_s9 = scalar_lea.vmem %s824_s1, %s504_s23  ;;  %s493_s23 = sld [smem:[#allocation4 + $0x80]]  ;;  %374 = vmatpush.msra.mxu0 %v345_v10 }
  0x20   :  { %233 = vrot.lane.b32.xlu1 %v232_v16, %s564_s29  ;;  %v302_v36 = vperm.slane %v297_v33, %v607_v2  ;;  %v310_v37 = vld [vmem:[%s309_s9] sm:$0x1]  ;;  %v339_v16 = vld [vmem:[%s825_s2 + $0x18] sm:$0xff]  ;;  %401 = vmatpush.msra.mxu1 %v354_v19 }
  0x21   :  { %88 = vrot.lane.b32.xlu0 %v87_v18, %s564_s29  ;;  %s265_s15 = scalar_lea.vmem %s824_s1, %s500_s7  ;;  %v315_v40 = vperm.slane %v310_v37, %v607_v2  ;;  %s501_s29 = sld [smem:[#allocation4 + $0x88]]  ;;  %375 = vmatpush.msra.mxu0 %v344_v11  ;;  %v340_v15 = vld [vmem:[%s825_s2 + $0x20] sm:$0xff]  ;;  %v338_v18 = vld [vmem:[%s825_s2 + $0x10] sm:$0xff] }
  0x22   :  { %v266_v39 = vld [vmem:[%s265_s15] sm:$0x1]  ;;  %402 = vmatpush.msra.mxu1 %v353_v21 }
  0x23   :  { %v271_v42 = vperm.slane %v266_v39, %v607_v2  ;;  %376 = vmatpush.msra.mxu0 %v343_v12  ;;  %v409_v37 = vld [vmem:[%s827_s4] sm:$0xff] }
  0x25   :  { %102 = vrot.lane.b32.xlu2 %v101_v23, %s565_s17  ;;  %s182_s27 = scalar_lea.vmem %s824_s1, %s493_s23  ;;  %377 = vmatpush.msra.mxu0 %v342_v13  ;;  %v352_v23 = vld [vmem:[%s825_s2 + $0x80] sm:$0xff] }
  0x26   :  { %v183_v44 = vld [vmem:[%s182_s27] sm:$0x1]  ;;  %403 = vmatpush.msra.mxu1 %v352_v23 }
  0x27   :  { %184 = vst.msk [vmem:[#allocation2 + $0x1] sm:$0x1] %vm35_vm0, %v183_v44  ;;  %s278_s8 = scalar_lea.vmem %s824_s1, %s501_s29  ;;  %378 = vmatpush.msra.mxu0 %v341_v14  ;;  %v518_v44 = vld [vmem:[%s828_s5] ss:$0 sm:$0xff] }
  0x28   :  { %246 = vrot.lane.b32.xlu1 %v245_v22, %s565_s17  ;;  %s567_s17 = smov 112   ;;  %v279_v48 = vld [vmem:[%s278_s8] sm:$0x1]  ;;  %s568_s8 = smov [#allocation5]  }
  0x29   :  { %149 = vrot.lane.b32.xlu0 %v148_v24, %s562_s20  ;;  %280 = vst.msk [vmem:[#allocation2 + $0x3] sm:$0x1] %vm35_vm0, %v279_v48  ;;  %379 = vmatpush.msra.mxu0 %v340_v15  ;;  %v336_v22 = vld [vmem:[%s825_s2] sm:$0xff] }
  0x2b   :  { %380 = vmatpush.msra.mxu0 %v339_v16 }
  0x2d   :  { %290 = vrot.lane.b32.xlu2 %v289_v29, %s562_s20  ;;  %s168_s20 = scalar_lea.vmem %s824_s1, %s492_s28  ;;  %s489_s28 = sld [smem:[#allocation4 + $0x8]]  ;;  %381 = vmatpush.msra.mxu0 %v338_v18 }
  0x2e   :  { %v169_v38 = vld [vmem:[%s168_s20] sm:$0x1] }
  0x2f   :  { %v174_v41 = vperm.slane %v169_v38, %v607_v2  ;;  %382 = vmatpush.msra.mxu0 %v337_v20  ;;  %v517_v38 = vld [vmem:[%s826_s3] ss:$0 sm:$0xff] }
  0x30   :  { %162 = vrot.lane.b32.xlu1 %v161_v28, %s561_s19 }
  0x31   :  { %116 = vrot.lane.b32.xlu0 %v115_v30, %s566_s0  ;;  %383 = vmatpush.msra.mxu0 %v336_v22 }
  0x33   :  { %s137_s30 = scalar_lea.vmem %s824_s1, %s489_s28 }
  0x34   :  { %v138_v47 = vld [vmem:[%s137_s30] sm:$0x1] }
  0x35   :  { %259 = vrot.lane.b32.xlu2 %v258_v35, %s566_s0  ;;  %139 = vst.msk [vmem:[#allocation2 + $0x2] sm:$0x1] %vm35_vm0, %v138_v47  ;;  %v411_v35 = vld [vmem:[%s827_s4 + $0x10] sm:$0xff] }
  0x38   :  { %130 = vrot.lane.b32.xlu1 %v129_v34, %s567_s17  ;;  %v412_v34 = vld [vmem:[%s827_s4 + $0x18] sm:$0xff] }
  0x39   :  { %303 = vrot.lane.b32.xlu0 %v302_v36, %s561_s19  ;;  %s33_s19 = scalar_lea.vmem %s824_s1, %s32_s16  ;;  %432 = vmatpush.msra.mxu2 %v412_v34  ;;  %v410_v36 = vld [vmem:[%s827_s4 + $0x8] sm:$0xff]  ;;  %s447_s1 = sshll.u32 %s568_s8, 4  ;;  %s448_s1 = int_to_ptr.vmem [resolvable:$true] %s447_s1 }
  0x3a   :  { %v34_v43 = vld [vmem:[%s33_s19] sm:$0x1] }
  0x3b   :  { %36 = vst.msk [vmem:[#allocation2] sm:$0x1] %vm35_vm0, %v34_v43  ;;  %433 = vmatpush.msra.mxu2 %v411_v35 }
  0x3d   :  { %175 = vrot.lane.b32.xlu2 %v174_v41, %s563_s13  ;;  %434 = vmatpush.msra.mxu2 %v410_v36 }
  0x3f   :  { %435 = vmatpush.msra.mxu2 %v409_v37 }
  0x40   :  { %316 = vrot.lane.b32.xlu1 %v315_v40, %s563_s13 }
  0x41   :  { %272 = vrot.lane.b32.xlu0 %v271_v42, %s567_s17 }
  0x6f   :  { %v75_v45 = vpop.permute.xlu2 %74 }
  0x77   :  { %v221_v46 = vpop.permute.xlu2 %220 }
  0x7f   :  { %v103_v50 = vpop.permute.xlu2 %102 }
  0x82   :  { %v61_v49 = vpop.permute.xlu1 %60 }
  0x83   :  { %v47_v51 = vpop.permute.xlu0 %46 }
  0x84   :  { %50 = vst.msk [vmem:[#allocation2] sm:$0x1] %vm49_vm1, %v47_v51 }
  0x85   :  { %64 = vst.msk [vmem:[#allocation2] sm:$0x1] %vm63_vm2, %v61_v49 }
  0x86   :  { %78 = vst.msk [vmem:[#allocation2] sm:$0x1] %vm77_vm3, %v75_v45 }
  0x87   :  { %v291_v53 = vpop.permute.xlu2 %290 }
  0x88   :  { %293 = vst.msk [vmem:[#allocation2 + $0x3] sm:$0x1] %vm49_vm1, %v291_v53 }
  0x8a   :  { %v208_v52 = vpop.permute.xlu1 %207 }
  0x8b   :  { %v195_v54 = vpop.permute.xlu0 %194 }
  0x8c   :  { %197 = vst.msk [vmem:[#allocation2 + $0x1] sm:$0x1] %vm49_vm1, %v195_v54 }
  0x8d   :  { %210 = vst.msk [vmem:[#allocation2 + $0x1] sm:$0x1] %vm63_vm2, %v208_v52 }
  0x8e   :  { %223 = vst.msk [vmem:[#allocation2 + $0x1] sm:$0x1] %vm77_vm3, %v221_v46 }
  0x8f   :  { %v260_v57 = vpop.permute.xlu2 %259 }
  0x92   :  { %v234_v55 = vpop.permute.xlu1 %233 }
  0x93   :  { %236 = vst.msk [vmem:[#allocation2 + $0x1] sm:$0x1] %vm91_vm4, %v234_v55  ;;  %v89_v56 = vpop.permute.xlu0 %88 }
  0x94   :  { %92 = vst.msk [vmem:[#allocation2] sm:$0x1] %vm91_vm4, %v89_v56 }
  0x95   :  { %106 = vst.msk [vmem:[#allocation2] sm:$0x1] %vm105_vm5, %v103_v50 }
  0x97   :  { %v176_v61 = vpop.permute.xlu2 %175 }
  0x9a   :  { %v247_v58 = vpop.permute.xlu1 %246 }
  0x9b   :  { %249 = vst.msk [vmem:[#allocation2 + $0x1] sm:$0x1] %vm105_vm5, %v247_v58  ;;  %v150_v59 = vpop.permute.xlu0 %149 }
  0x9c   :  { %152 = vst.msk [vmem:[#allocation2 + $0x2] sm:$0x1] %vm49_vm1, %v150_v59 }
  0x9d   :  { %262 = vst.msk [vmem:[#allocation2 + $0x1] sm:$0x1] %vm119_vm6, %v260_v57 }
  0xa2   :  { %v163_v60 = vpop.permute.xlu1 %162 }
  0xa3   :  { %165 = vst.msk [vmem:[#allocation2 + $0x2] sm:$0x1] %vm63_vm2, %v163_v60  ;;  %v117_v62 = vpop.permute.xlu0 %116 }
  0xa4   :  { %120 = vst.msk [vmem:[#allocation2] sm:$0x1] %vm119_vm6, %v117_v62 }
  0xa5   :  { %178 = vst.msk [vmem:[#allocation2 + $0x2] sm:$0x1] %vm77_vm3, %v176_v61 }
  0xaa   :  { %v131_v63 = vpop.permute.xlu1 %130 }
  0xab   :  { %134 = vst.msk [vmem:[#allocation2] sm:$0x1] %vm133_vm7, %v131_v63  ;;  %v304_v0 = vpop.permute.xlu0 %303 }
  0xac   :  { %306 = vst.msk [vmem:[#allocation2 + $0x3] sm:$0x1] %vm63_vm2, %v304_v0 }
  0xb2   :  { %v317_v1 = vpop.permute.xlu1 %316 }
  0xb3   :  { %319 = vst.msk [vmem:[#allocation2 + $0x3] sm:$0x1] %vm77_vm3, %v317_v1  ;;  %v273_v2 = vpop.permute.xlu0 %272 }
  0xb4   :  { %275 = vst.msk [vmem:[#allocation2 + $0x1] sm:$0x1] %vm133_vm7, %v273_v2 }
  0xbb   :  { %v320_v3 = vld [vmem:[#allocation2] sm:$0xf] }
  0xbc   :  { %329 = vrot.lane.b32.xlu0 %v320_v3, %s566_s0  ;;  %322 = vrot.lane.b32.xlu2 %v320_v3, %s567_s17 }
 0x116   :  { %v323_v24 = vpop.permute.xlu2 %322 }
 0x117   :  { %v324_v25 = vrot.slane %v323_v24, 2 }
 0x119   :  { %v326_v26 = vsel %vm325_vm8, %v323_v24, %v324_v25 }
 0x11a   :  { %v328_v29 = vmax.f32 %v320_v3, %v326_v26 }
 0x12e   :  { %v330_v27 = vpop.permute.xlu0 %329 }
 0x12f   :  { %v331_v28 = vrot.slane %v330_v27, 2 }
 0x131   :  { %v333_v30 = vsel %vm332_vm9, %v330_v27, %v331_v28 }
 0x132   :  { %v335_v31 = vmax.f32 %v328_v29, %v333_v30 }
 0x134   :  { %361 = vst [vmem:[#allocation1] ss:$4 sm:$0xff] %v335_v31 }
 0x13b   :  { %v362_v32 = vld.sshfl [vmem:[#allocation1] sm:$0xff pattern:$0x73625140]  ;;  %v363_v33 = vld.sshfl [vmem:[#allocation1 + $0x8] sm:$0xff pattern:$0x73625140] }
 0x13c   :  { %384 = vmatmul.f32.vlgmr.msra.gmra.mxu0 %v362_v32  ;;  %505 = vmatmul.msk.f32.vlgmr.msra.gmra.mxu1 %vm365_vm10, %v363_v33 }
 0x1b9   :  { %v385_v39 = vpop.f32.mrf.mxu0  ;;  %v405_v41 = vpop.f32.mrf.mxu1 }
 0x1ba   :  { %v386_v40 = vadd.f32 %v517_v38, %v385_v39 }
 0x1bc   :  { %v406_v42 = vadd.f32 %v405_v41, %v386_v40 }
 0x1be   :  { %v408_v43 = vmax.f32 %v406_v42, 0.0 }
 0x1c0   :  { %506 = vmatmul.msk.f32.vlgmr.msra.gmra.mxu2 %vm365_vm10, %v408_v43 }
 0x243   :  { %v437_v45 = vpop.f32.mrf.mxu2 }
 0x244   :  { %v438_v46 = vadd.f32 %v518_v44, %v437_v45 }
 0x246   :  { %441 = vst.msk [vmem:[#allocation5] sm:$0x3] %vm440_vm11, %v438_v46 }
 0x247   :  { %452 = dma.vmem_to_hbm [thread:$0]  %s448_s1, 32, %s450_s11, [#allocation6]  }
 0x248   :  { %557 = dma.done.wait [#allocation6], 32  }
 0x249   :  { %558 = vsyncadd [#allocation6], 4294967264 }
 0x24a   :  { %457 = vsyncpa [#allocation6], 1 }

</bundles_post_ra>
